<compile_context>
chip_gen: v7x
topology: tpu7x:2x2x1
jax: 0.10.0
libtpu: 0.0.40
codegen_flags: <defaults>
</compile_context>

<pallas_src>
import jax
import jax.numpy as jnp
from jax.experimental import pallas as pl
from jax.experimental.pallas import tpu as pltpu


# ---------------------------------------------------------------------------
# Kernel bodies
# ---------------------------------------------------------------------------
def _sobel_compute(pad_ref, out_ref):
    """Separable 3x3 Sobel on a zero/halo-padded VMEM tile.

    pad_ref: (TH+2, W+2) padded tile (VMEM scratch); out_ref block: (1, 2, TH, W).
    """
    th = out_ref.shape[2]
    w = out_ref.shape[3]
    xp = pad_ref[...]                      # (TH+2, W+2)

    top = xp[0:th, :]
    mid = xp[1:th + 1, :]
    bot = xp[2:th + 2, :]
    v = top + 2.0 * mid + bot              # vertical [1, 2, 1], full padded width
    g = top - bot                          # vertical [1, 0, -1], full padded width

    gx = v[:, 0:w] - v[:, 2:w + 2]                            # horizontal [1, 0, -1]
    gy = g[:, 0:w] + 2.0 * g[:, 1:w + 1] + g[:, 2:w + 2]      # horizontal [1, 2, 1]

    out_ref[0, 0] = gx.astype(out_ref.dtype)
    out_ref[0, 1] = gy.astype(out_ref.dtype)


def _sobel_kernel_single(x_ref, out_ref, pad_ref):
    """Whole image per grid step (small images). Halo is plain zero padding."""
    h = x_ref.shape[1]
    w = x_ref.shape[2]
    # Zero halo border (zeroing the whole scratch keeps the stores simple/aligned),
    # then drop the image into the centre.
    pad_ref[...] = jnp.zeros_like(pad_ref)
    pad_ref[1:h + 1, 1:w + 1] = x_ref[0]
    _sobel_compute(pad_ref, out_ref)


def _sobel_kernel_tiled(x_ref, up_ref, dn_ref, out_ref, pad_ref):
    """H-tiled path: x_ref (1, TH, W) tile, up/dn (1, 8, W) halo row blocks."""
    i = pl.program_id(1)
    n_i = pl.num_programs(1)
    th = x_ref.shape[1]
    w = x_ref.shape[2]

    pad_ref[...] = jnp.zeros_like(pad_ref)
    pad_ref[1:th + 1, 1:w + 1] = x_ref[0]

    # Halo rows: last row of the 8-row block just above this tile and first row of
    # the block just below; zero at the image top/bottom boundary.
    zero_row = jnp.zeros((1, w), x_ref.dtype)
    row_above = jnp.where(i > 0, up_ref[0, 7:8, :], zero_row)
    row_below = jnp.where(i < n_i - 1, dn_ref[0, 0:1, :], zero_row)
    pad_ref[0:1, 1:w + 1] = row_above
    pad_ref[th + 1:th + 2, 1:w + 1] = row_below

    _sobel_compute(pad_ref, out_ref)


# ---------------------------------------------------------------------------
# Wrapper
# ---------------------------------------------------------------------------
_VMEM_LIMIT_BYTES = 32 * 1024 * 1024   # safe on v5e (raise from 16 MiB) / v6e / v7x


def _pick_tile_rows(H, W, itemsize, tile_bytes):
    """Largest multiple-of-8 divisor of H whose (rows x W) input tile fits tile_bytes."""
    if H % 8 != 0:
        return None
    max_rows = max(8, (tile_bytes // max(1, W * itemsize)) // 8 * 8)
    limit = min(H, max_rows, 1024)
    best = None
    th = 8
    while th <= limit:
        if H % th == 0:
            best = th
        th += 8
    return best


def sobel(x, *, tile_rows=None, tile_bytes=2 << 20):
    """Sobel edge gradients. x: (N, 1, H, W) -> (N, 2, H, W) = [Gx, Gy]."""
    N, C, H, W = x.shape
    assert C == 1, "Sobel module expects a single input channel"
    dt = x.dtype
    itemsize = jnp.dtype(dt).itemsize
    x2 = x.reshape(N, H, W)
    out_shape = jax.ShapeDtypeStruct((N, 2, H, W), dt)

    if tile_rows is None:
        if H * W * itemsize <= tile_bytes:
            th = None                              # whole image per grid step
        else:
            th = _pick_tile_rows(H, W, itemsize, tile_bytes)
    else:
        assert tile_rows % 8 == 0 and H % tile_rows == 0 and tile_rows <= H
        th = tile_rows

    if th is None or th >= H:
        # Single-tile path (also the fallback when H is not a multiple of 8).
        # TODO(synk): very large images whose H is not a multiple of 8 fall back to
        # a whole-image tile and may exceed the VMEM budget.
        return pl.pallas_call(
            _sobel_kernel_single,
            out_shape=out_shape,
            grid_spec=pltpu.PrefetchScalarGridSpec(
                num_scalar_prefetch=0,
                grid=(N,),
                in_specs=[pl.BlockSpec((1, H, W), lambda n: (n, 0, 0))],
                out_specs=pl.BlockSpec((1, 2, H, W), lambda n: (n, 0, 0, 0)),
                scratch_shapes=[pltpu.VMEM((H + 2, W + 2), dt)],
            ),
            compiler_params=pltpu.CompilerParams(
                dimension_semantics=("parallel",),
                vmem_limit_bytes=_VMEM_LIMIT_BYTES),
        )(x2)

    n_i = H // th          # number of H tiles
    hb = th // 8           # tile height in units of 8-row halo blocks
    n_hb = H // 8          # number of 8-row blocks along H

    return pl.pallas_call(
        _sobel_kernel_tiled,
        out_shape=out_shape,
        grid_spec=pltpu.PrefetchScalarGridSpec(
            num_scalar_prefetch=0,
            grid=(N, n_i),
            in_specs=[
                # centre tile
                pl.BlockSpec((1, th, W), lambda n, i: (n, i, 0)),
                # 8-row block just above the tile (clamped at the top of the image)
                pl.BlockSpec((1, 8, W),
                             lambda n, i: (n, jnp.maximum(i * hb - 1, 0), 0)),
                # 8-row block just below the tile (clamped at the bottom)
                pl.BlockSpec((1, 8, W),
                             lambda n, i: (n, jnp.minimum((i + 1) * hb, n_hb - 1), 0)),
            ],
            out_specs=pl.BlockSpec((1, 2, th, W), lambda n, i: (n, 0, i, 0)),
            scratch_shapes=[pltpu.VMEM((th + 2, W + 2), dt)],
        ),
        compiler_params=pltpu.CompilerParams(
            dimension_semantics=("parallel", "parallel"),
            vmem_limit_bytes=_VMEM_LIMIT_BYTES),
    )(x2, x2, x2)


# ---------------------------------------------------------------------------
# Pure-JAX reference (same math as the PyTorch Conv2d with fixed weights)
# ---------------------------------------------------------------------------
def _sobel_ref(x):
    kx = jnp.array([[1, 0, -1], [2, 0, -2], [1, 0, -1]], jnp.float32)
    ky = jnp.array([[1, 2, 1], [0, 0, 0], [-1, -2, -1]], jnp.float32)
    w = jnp.stack([kx, ky])[:, None, :, :]            # (2,1,3,3) OIHW
    return jax.lax.conv_general_dilated(
        x, w, window_strides=(1, 1), padding=((1, 1), (1, 1)),
        dimension_numbers=("NCHW", "OIHW", "NCHW"))


if __name__ == "__main__":
    key = jax.random.PRNGKey(0)
    k1, k2 = jax.random.split(key)

    # Small case matching the module interface (single-tile path).
    x_small = jax.random.normal(k1, (2, 1, 16, 16), dtype=jnp.float32)
    out_small = jax.block_until_ready(sobel(x_small))
    ref_small = _sobel_ref(x_small)
    assert out_small.shape == (2, 2, 16, 16)
    assert jnp.allclose(out_small, ref_small, atol=1e-5, rtol=1e-5)

    # Exercise the H-tiled path (forced 8-row tiles) to validate halo handling.
    x_tiled = jax.random.normal(k2, (2, 1, 32, 128), dtype=jnp.float32)
    out_tiled = jax.block_until_ready(sobel(x_tiled, tile_rows=8))
    ref_tiled = _sobel_ref(x_tiled)
    assert out_tiled.shape == (2, 2, 32, 128)
    assert jnp.allclose(out_tiled, ref_tiled, atol=1e-5, rtol=1e-5)

    print("KERNEL_OK")
</pallas_src>

<mosaic_0001>
module attributes {stable_mosaic.version = 11 : i64} {
  func.func @_sobel_kernel_single(%arg0: i32, %arg1: memref<1x16x16xf32, #tpu.memory_space<vmem>>, %arg2: memref<1x2x16x16xf32, #tpu.memory_space<vmem>>, %arg3: memref<18x18xf32, #tpu.memory_space<vmem>>) attributes {dimension_semantics = [#tpu.dimension_semantics<parallel>], iteration_bounds = array<i64: 2>, scalar_prefetch = 0 : i64, scratch_operands = 1 : i64, tpu.core_type = #tpu.core_type<tc>, window_params = [{transform_indices = @transform_0, window_bounds = array<i64: 1, 16, 16>}, {transform_indices = @transform_1, window_bounds = array<i64: 1, 2, 16, 16>}]} {
    %cst = arith.constant 0.000000e+00 : f32
    %0 = vector.broadcast %cst : f32 to vector<18x18xf32>
    %c0 = arith.constant 0 : index
    %c0_0 = arith.constant 0 : index
    %1 = vector.load %arg3[%c0, %c0_0] : memref<18x18xf32, #tpu.memory_space<vmem>>, vector<18x18xf32>
    tpu.vector_store %arg3[%c0, %c0_0], %0 {strides = array<i32>} : memref<18x18xf32, #tpu.memory_space<vmem>>, vector<18x18xf32>,
    %c0_1 = arith.constant 0 : index
    %c0_2 = arith.constant 0 : index
    %c0_3 = arith.constant 0 : index
    %2 = vector.load %arg1[%c0_1, %c0_2, %c0_3] : memref<1x16x16xf32, #tpu.memory_space<vmem>>, vector<1x16x16xf32>
    %3 = vector.shape_cast %2 : vector<1x16x16xf32> to vector<16x16xf32>
    %c1 = arith.constant 1 : index
    %c1_4 = arith.constant 1 : index
    %4 = vector.load %arg3[%c1, %c1_4] : memref<18x18xf32, #tpu.memory_space<vmem>>, vector<16x16xf32>
    tpu.vector_store %arg3[%c1, %c1_4], %3 {strides = array<i32>} : memref<18x18xf32, #tpu.memory_space<vmem>>, vector<16x16xf32>,
    %c0_5 = arith.constant 0 : index
    %c0_6 = arith.constant 0 : index
    %5 = vector.load %arg3[%c0_5, %c0_6] : memref<18x18xf32, #tpu.memory_space<vmem>>, vector<18x18xf32>
    %6 = vector.extract_strided_slice %5 {offsets = [0, 0], sizes = [16, 18], strides = [1, 1]} : vector<18x18xf32> to vector<16x18xf32>
    %7 = vector.extract_strided_slice %5 {offsets = [1, 0], sizes = [16, 18], strides = [1, 1]} : vector<18x18xf32> to vector<16x18xf32>
    %8 = vector.extract_strided_slice %5 {offsets = [2, 0], sizes = [16, 18], strides = [1, 1]} : vector<18x18xf32> to vector<16x18xf32>
    %cst_7 = arith.constant 2.000000e+00 : f32
    %9 = vector.broadcast %cst_7 : f32 to vector<16x18xf32>
    %10 = arith.mulf %9, %7 : vector<16x18xf32>
    %11 = arith.addf %6, %10 : vector<16x18xf32>
    %12 = arith.addf %11, %8 : vector<16x18xf32>
    %13 = arith.subf %6, %8 : vector<16x18xf32>
    %14 = vector.extract_strided_slice %12 {offsets = [0, 0], sizes = [16, 16], strides = [1, 1]} : vector<16x18xf32> to vector<16x16xf32>
    %15 = vector.extract_strided_slice %12 {offsets = [0, 2], sizes = [16, 16], strides = [1, 1]} : vector<16x18xf32> to vector<16x16xf32>
    %16 = arith.subf %14, %15 : vector<16x16xf32>
    %17 = vector.extract_strided_slice %13 {offsets = [0, 0], sizes = [16, 16], strides = [1, 1]} : vector<16x18xf32> to vector<16x16xf32>
    %18 = vector.extract_strided_slice %13 {offsets = [0, 1], sizes = [16, 16], strides = [1, 1]} : vector<16x18xf32> to vector<16x16xf32>
    %cst_8 = arith.constant 2.000000e+00 : f32
    %19 = vector.broadcast %cst_8 : f32 to vector<16x16xf32>
    %20 = arith.mulf %19, %18 : vector<16x16xf32>
    %21 = arith.addf %17, %20 : vector<16x16xf32>
    %22 = vector.extract_strided_slice %13 {offsets = [0, 2], sizes = [16, 16], strides = [1, 1]} : vector<16x18xf32> to vector<16x16xf32>
    %23 = arith.addf %21, %22 : vector<16x16xf32>
    %c0_9 = arith.constant 0 : index
    %c0_10 = arith.constant 0 : index
    %c0_11 = arith.constant 0 : index
    %c0_12 = arith.constant 0 : index
    %24 = vector.load %arg2[%c0_9, %c0_10, %c0_11, %c0_12] : memref<1x2x16x16xf32, #tpu.memory_space<vmem>>, vector<1x1x16x16xf32>
    %25 = vector.shape_cast %24 : vector<1x1x16x16xf32> to vector<16x16xf32>
    %26 = vector.shape_cast %16 : vector<16x16xf32> to vector<1x1x16x16xf32>
    tpu.vector_store %arg2[%c0_9, %c0_10, %c0_11, %c0_12], %26 {strides = array<i32>} : memref<1x2x16x16xf32, #tpu.memory_space<vmem>>, vector<1x1x16x16xf32>,
    %c0_13 = arith.constant 0 : index
    %c1_14 = arith.constant 1 : index
    %c0_15 = arith.constant 0 : index
    %c0_16 = arith.constant 0 : index
    %27 = vector.load %arg2[%c0_13, %c1_14, %c0_15, %c0_16] : memref<1x2x16x16xf32, #tpu.memory_space<vmem>>, vector<1x1x16x16xf32>
    %28 = vector.shape_cast %27 : vector<1x1x16x16xf32> to vector<16x16xf32>
    %29 = vector.shape_cast %23 : vector<16x16xf32> to vector<1x1x16x16xf32>
    tpu.vector_store %arg2[%c0_13, %c1_14, %c0_15, %c0_16], %29 {strides = array<i32>} : memref<1x2x16x16xf32, #tpu.memory_space<vmem>>, vector<1x1x16x16xf32>,
    return
  }
  func.func @transform_0(%arg0: i32) -> (i32, i32, i32) {
    %c0_i32 = arith.constant 0 : i32
    %c0_i32_0 = arith.constant 0 : i32
    %c0_i32_1 = arith.constant 0 : i32
    return %arg0, %c0_i32, %c0_i32_0 : i32, i32, i32
  }
  func.func @transform_1(%arg0: i32) -> (i32, i32, i32, i32) {
    %c0_i32 = arith.constant 0 : i32
    %c0_i32_0 = arith.constant 0 : i32
    %c0_i32_1 = arith.constant 0 : i32
    %c0_i32_2 = arith.constant 0 : i32
    return %arg0, %c0_i32, %c0_i32_0, %c0_i32_1 : i32, i32, i32, i32
  }
}

</mosaic_0001>

<bundles_post_ra>
// kernel: tpu_custom_call.1
= control target key start
LH: loop header
LB: loop body
LE: loop exit
PB: predicated region body
PF: predicated region fallthrough
CT: control target
= control target key end

     0   :  { %6 = vsyncpa [#allocation4], 0  ;;  %s669_s0 = inlined_call_operand.hbm [shape: f32[2,16,16], index: 0, kind: input, shape index: {}]   ;;  %s670_s1 = inlined_call_operand.hbm [shape: f32[2,2,16,16], index: 1, kind: output, shape index: {}]  }
   0x1   :  { %8 = vsyncpa [#allocation4 + $0x1], 0 }
   0x2   :  { %9 = vsyncpa [#allocation5], 0 }
   0x3   :  { %11 = vsyncpa [#allocation5 + $0x1], 0  ;;  %s502_s6 = smov 0   ;;  %s504_s7 = smov 0  }
   0x4   :  { %s506_s8 = smov 0   ;;  %s508_s9 = smov 0  }
   0x5 LB: > { %s523_s10 = sadd.s32 4294967295, %s480_s9   ;;  %s312_s11 = sadd.s32 4294967294, %s480_s9   ;;  %s480_s9 = sphi %s508_s9, %s683_s9   ;;  %s476_s8 = sphi %s506_s8, %s682_s8   ;;  %s472_s7 = sphi %s504_s7, %s681_s7   ;;  %s468_s6 = sphi %s502_s6, %s680_s6  }
   0x6   : > { %s527_s12 = sadd.s32 1, %s480_s9   ;;  %s24_s13 = sadd.s32 1, %s476_s8 }
   0x7   : > { %s21_s14 = ssub.s32 %s480_s9, %s527_s12  ;;  %p31_p0 = scmp.ne.s32.totalorder %s476_s8, %s472_s7 }
   0x8   : > { %p22_p1 = scmp.eq.s32.totalorder %s21_s14, 0  ;;  %p32_p2 = scmp.eq.s32.totalorder %s480_s9, 0 }
   0x9   : > { %p37_p3 = scmp.ne.s32.totalorder %s472_s7, %s468_s6  ;;  %p38_p4 = scmp.eq.s32.totalorder %s523_s10, 0 }
   0xa   : > { %s539_s15 = scalar_select %p22_p1, %s476_s8, %s24_s13  }
   0xb   : > { %p541_p5 = por %p32_p2, %p31_p0  ;;  %p545_p6 = por %p38_p4, %p37_p3 }
   0xc   : > { %p61_p7 = scmp.eq.s32.totalorder %s523_s10, 1  ;;  %p67_p8 = scmp.eq.s32.totalorder %s312_s11, 1 }
   0xd   : > { %p342_p10 = scmp.lt.s32.totalorder %s480_s9, 2  ;;  %s87_s20 = sand.u32 1, %s476_s8  }
   0xe   : > { %p552_p11 = por %p61_p7, %p31_p0  ;;  %p556_p12 = por %p67_p8, %p37_p3 }
   0xf   : > { %s328_s21 = sshll.u32 %s480_s9, 8  ;;  %s315_s22 = sshll.u32 %s87_s20, 4 }
  0x10   : > { %s674_s18 = scalar_select %p552_p11, 1, 0 }
  0x11   : > { %s675_s19 = scalar_select %p556_p12, 1, 0 }
  0x12   : > { %s565_s25 = scalar_lea.hbm %s669_s0, %s328_s21  ;;  %s91_s26 = scalar_lea.vmem [#allocation3], %s315_s22 }
  0x13   : > { %s98_s27 = sshll.u32 %s91_s26, 4  ;;  %p569_p13 = pnand %p342_p10, %p541_p5  ;;  %s573_s27 = int_to_ptr.vmem [resolvable:$true] %s98_s27 }
  0x14   : > { %s575_s29 = scalar_lea.sflag [#allocation4], %s87_s20  ;;  %s384_s30 = scalar_lea.hbm %s565_s25, 256 }
  0x15   : > { %p385_p0 = scmp.ne.s32.totalorder %s565_s25, %s384_s30  ;;  %p386_p1 = pneg %p569_p13 }
  0x16   : > { %s389_s4 = scalar_lea.hbm %s669_s0, 512  ;;  %p390_p4 = scmp.lt.u32.totalorder %s565_s25, %s669_s0 }
  0x17   : > { %p387_p2 = pnand %p386_p1, %p385_p0  ;;  %p391_p5 = scmp.lt.u32.totalorder %s389_s4, %s384_s30 }
  0x18   : > { %p393_p8 = scmp.lt.u32.totalorder %s384_s30, %s565_s25 }
  0x19   : > { %p388_p3 = pneg %p387_p2  ;;  %p392_p7 = por %p391_p5, %p390_p4 }
  0x1b   : > { %p394_p10 = por %p393_p8, %p392_p7 }
  0x1d   : > { %p395_p9 = pnand %p394_p10, %p388_p3 }
  0x1f   : > { %398 = shalt.err (!%p395_p9)
}
  0x20   : > { %s399_s13 = scalar_lea.vmem %s573_s27, 256  ;;  %s482_s14 = smov [#allocation3]  }
  0x21   : > { %p400_p0 = scmp.ne.s32.totalorder %s573_s27, %s399_s13  ;;  %s404_s16 = sshll.u32 %s482_s14, 4  ;;  %s405_s16 = int_to_ptr.vmem [resolvable:$false] %s404_s16 }
  0x22   : > { %s406_s20 = scalar_lea.vmem %s405_s16, 512  ;;  %p407_p11 = scmp.lt.s32.totalorder %s573_s27, %s405_s16 }
  0x23   : > { %p402_p2 = pnand %p400_p0, %p386_p1  ;;  %p408_p4 = scmp.lt.s32.totalorder %s406_s20, %s399_s13 }
  0x25   : > { %p403_p12 = pneg %p402_p2  ;;  %p409_p5 = por %p408_p4, %p407_p11 }
  0x27   : > { %p410_p7 = pnand %p409_p5, %p403_p12 }
  0x29   : > { %413 = shalt.err (!%p410_p7)
}
  0x2a   : > { %s483_s21 = smov 128   ;;  %s484_s22 = smov 8  }
  0x2b   : > { %337 = dma.hbm_to_vmem [thread:$0]  (!%p569_p13), %s565_s25, 256, %s573_s27, %s575_s29, %s483_s21, %s483_s21, %s484_s22  }
  0x2c   : > { %p318_p9 = scmp.ge.s32.totalorder %s480_s9, 1  ;;  %p106_p1 = scmp.lt.s32.totalorder %s480_s9, 3 }
  0x2e   : > { %p107_p3 = pnand %p318_p9, %p106_p1 }
  0x2f   : > { %s606_s23 = sand.u32 (!%p107_p3), 1, %s472_s7  }
  0x30   : > { %110 = sbr.rel (%p107_p3) target bundleno = 335 (0x14f), region = 24  ;;  %s319_s24 = sshll.u32 (!%p107_p3), %s606_s23, 4 }
  0x31   : > { %s113_s26 = scalar_lea.sflag (!%p107_p3), [#allocation4], %s606_s23  ;;  %s116_s30 = scalar_lea.vmem (!%p107_p3), [#allocation3], %s319_s24 }
  0x37   : > { %459 = dma.done.wait (%p545_p6), %s113_s26, 256  }
  0x38   : > { %461 = vsyncadd (%p545_p6), %s113_s26, 4294967040  ;;  %vm135_vm0 = vcmask 146432   ;;  %vm138_vm1 = vcmask 140288   ;;  %v485_v0 = vmov 0.0   ;;  %v140_v1 = vld [vmem:[%s116_s30] sm:$0xff]  ;;  %s486_s25 = smov 1  }
  0x39   : > { %136 = vst.msk [vmem:[#allocation2] sm:$0xff] %vm135_vm0, %v485_v0  ;;  %137 = vst.msk [vmem:[#allocation2 + $0x8] sm:$0xff] %vm135_vm0, %v485_v0  ;;  %144 = vrot.lane.b32.xlu0 %v140_v1, %s486_s25  ;;  %v141_v2 = vld [vmem:[%s116_s30 + $0x8] sm:$0xff]  ;;  %vm150_vm2 = vcmask 138248   ;;  %vm175_vm3 = vcmask 1045504   ;;  %vm162_vm4 = vcmask 1046528  }
  0x3a   : > { %139 = vst.msk [vmem:[#allocation2 + $0x10] sm:$0x3] %vm138_vm1, %v485_v0  ;;  %s487_s17 = smov 127   ;;  %s488_s27 = smov 126   ;;  %vm219_vm5 = vcmask 130048  }
  0x3b   : > { %s320_s28 = sshll.u32 %s606_s23, 5  ;;  %s329_s3 = sshll.u32 %s523_s10, 9 }
  0x3c   : > { %s134_s29 = scalar_lea.vmem [#allocation6], %s320_s28  ;;  %s624_s11 = scalar_lea.hbm %s670_s1, %s329_s3 }
  0x3d   : > { %146 = vrot.lane.b32.xlu0 %v141_v2, %s486_s25  ;;  %s239_s2 = sshll.u32 %s134_s29, 4  ;;  %s226_s13 = scalar_lea.sflag [#allocation5], %s606_s23  ;;  %s618_s2 = int_to_ptr.vmem [resolvable:$true] %s239_s2 }
  0x3e   : > { %s414_s14 = scalar_lea.vmem %s618_s2, 512  ;;  %p677_p11 = scmp.ne.s32.totalorder %s674_s18, 0 }
  0x3f   : > { %p415_p6 = scmp.ne.s32.totalorder %s618_s2, %s414_s14  ;;  %s489_s10 = smov [#allocation6]  }
  0x40   : > { %s418_s16 = sshll.u32 %s489_s10, 4  ;;  %s419_s16 = int_to_ptr.vmem [resolvable:$false] %s418_s16 }
  0x41   : > { %p416_p12 = pnand %p415_p6, %p677_p11  ;;  %s420_s20 = scalar_lea.vmem %s419_s16, 1024 }
  0x42   : > { %p421_p8 = scmp.lt.s32.totalorder %s618_s2, %s419_s16  ;;  %p422_p10 = scmp.lt.s32.totalorder %s420_s20, %s414_s14 }
  0x43   : > { %p417_p13 = pneg %p416_p12 }
  0x44   : > { %p423_p0 = por %p422_p10, %p421_p8 }
  0x46   : > { %p424_p2 = pnand %p423_p0, %p417_p13 }
  0xab   : > { %v145_v3 = vpop.permute.xlu0 %144 }
  0xac   : > { %151 = vst.msk [vmem:[#allocation2 + $0x1] sm:$0xff] %vm150_vm2, %v145_v3 }
  0xaf   : > { %v147_v4 = vpop.permute.xlu0 %146 }
  0xb0   : > { %152 = vst.msk [vmem:[#allocation2 + $0x9] sm:$0xff] %vm150_vm2, %v147_v4 }
  0xb3   : > { %v153_v5 = vld [vmem:[#allocation2] sm:$0xff] }
  0xb4   : > { %v156_v6 = vmul.f32 2.0, %v153_v5  ;;  %v176_v8 = vrot.slane %v153_v5, 2 }
  0xb6   : > { %v163_v14 = vrot.slane %v156_v6, 1 }
  0xb7   : > { %v154_v7 = vld [vmem:[#allocation2 + $0x8] sm:$0xff]  ;;  %v155_v9 = vld [vmem:[#allocation2 + $0x10] sm:$0x3] }
  0xb8   : > { %v177_v10 = vrot.slane %v154_v7, 2  ;;  %v157_v11 = vmul.f32 2.0, %v154_v7  ;;  %v179_v12 = vrot.slane %v155_v9, 2  ;;  %v158_v13 = vmul.f32 2.0, %v155_v9 }
  0xba   : > { %v178_v15 = vsel %vm175_vm3, %v176_v8, %v177_v10  ;;  %v164_v16 = vrot.slane %v157_v11, 1  ;;  %v180_v17 = vsel %vm175_vm3, %v177_v10, %v179_v12  ;;  %v166_v18 = vrot.slane %v158_v13, 1 }
  0xbb   : > { %v185_v19 = vsub.f32 %v153_v5, %v178_v15  ;;  %v186_v23 = vsub.f32 %v154_v7, %v180_v17 }
  0xbc   : > { %v165_v20 = vsel %vm162_vm4, %v163_v14, %v164_v16  ;;  %v167_v24 = vsel %vm162_vm4, %v164_v16, %v166_v18 }
  0xbd   : > { %v197_v21 = vmul.f32 2.0, %v185_v19  ;;  %v170_v22 = vadd.f32 %v165_v20, %v153_v5  ;;  %v198_v26 = vmul.f32 2.0, %v186_v23  ;;  %v171_v27 = vadd.f32 %v167_v24, %v154_v7 }
  0xbf   : > { %201 = vrot.lane.b32.xlu1 %v197_v21, %s487_s17  ;;  %v183_v25 = vadd.f32 %v178_v15, %v170_v22  ;;  %v184_v28 = vadd.f32 %v180_v17, %v171_v27 }
  0xc1   : > { %189 = vrot.lane.b32.xlu0 %v183_v25, %s488_s27 }
  0xc3   : > { %203 = vrot.lane.b32.xlu1 %v198_v26, %s487_s17 }
  0xc5   : > { %211 = vrot.lane.b32.xlu0 %v185_v19, %s488_s27 }
  0xc7   : > { %191 = vrot.lane.b32.xlu1 %v184_v28, %s488_s27 }
  0xcb   : > { %213 = vrot.lane.b32.xlu1 %v186_v23, %s488_s27 }
 0x131   : > { %v202_v29 = vpop.permute.xlu1 %201 }
 0x132   : > { %v207_v33 = vadd.f32 %v202_v29, %v185_v19 }
 0x133   : > { %v190_v30 = vpop.permute.xlu0 %189 }
 0x134   : > { %v195_v31 = vsub.f32 %v183_v25, %v190_v30 }
 0x135   : > { %v204_v32 = vpop.permute.xlu1 %203 }
 0x136   : > { %220 = vst.msk [vmem:[%s134_s29] sm:$0xff] %vm219_vm5, %v195_v31  ;;  %v208_v38 = vadd.f32 %v204_v32, %v186_v23 }
 0x137   : > { %v212_v34 = vpop.permute.xlu0 %211 }
 0x138   : > { %v217_v35 = vadd.f32 %v212_v34, %v207_v33 }
 0x139   : > { %v192_v36 = vpop.permute.xlu1 %191 }
 0x13a   : > { %321 = vst.msk [vmem:[%s134_s29 + $0x10] sm:$0xff] %vm219_vm5, %v217_v35  ;;  %v196_v37 = vsub.f32 %v184_v28, %v192_v36 }
 0x13c   : > { %221 = vst.msk [vmem:[%s134_s29 + $0x8] sm:$0xff] %vm219_vm5, %v196_v37 }
 0x13d   : > { %v214_v39 = vpop.permute.xlu1 %213 }
 0x13e   : > { %v218_v40 = vadd.f32 %v214_v39, %v208_v38 }
 0x140   : > { %322 = vst.msk [vmem:[%s134_s29 + $0x18] sm:$0xff] %vm219_vm5, %v218_v40 }
 0x141   : > { %427 = shalt.err (!%p424_p2)
}
 0x142   : > { %s428_s21 = scalar_lea.hbm %s624_s11, 512  ;;  %s432_s26 = scalar_lea.hbm %s670_s1, 1024 }
 0x143   : > { %p429_p4 = scmp.ne.s32.totalorder %s624_s11, %s428_s21  ;;  %p433_p9 = scmp.lt.u32.totalorder %s624_s11, %s670_s1 }
 0x144   : > { %p434_p1 = scmp.lt.u32.totalorder %s432_s26, %s428_s21  ;;  %p436_p6 = scmp.lt.u32.totalorder %s428_s21, %s624_s11 }
 0x145   : > { %p430_p5 = pnand %p429_p4, %p677_p11 }
 0x146   : > { %p435_p3 = por %p434_p1, %p433_p9 }
 0x147   : > { %p431_p7 = pneg %p430_p5 }
 0x148   : > { %p437_p12 = por %p436_p6, %p435_p3 }
 0x14a   : > { %p438_p13 = pnand %p437_p12, %p431_p7 }
 0x14c   : > { %441 = shalt.err (!%p438_p13)
}
 0x14d   : > { %s490_s17 = smov 128   ;;  %s491_s27 = smov 8  }
 0x14e   : > { %332 = dma.vmem_to_hbm [thread:$0]  (%p677_p11), %s618_s2, 512, %s624_s11, %s226_s13, %s490_s17, %s490_s17, %s491_s27  }
 0x14f PF: > { %s254_s28 = sand.u32 1, %s468_s6   ;;  %p678_p8 = scmp.ne.s32.totalorder %s675_s19, 0 }
 0x150   : > { %p679_p10 = scmp.ge.s32.totalorder %s480_s9, 2  ;;  %s255_s29 = scalar_lea.sflag [#allocation5], %s254_s28 }
 0x152   : > { %p339_p0 = pnand %p679_p10, %p678_p8 }
 0x154   : > { %463 = dma.done.wait (!%p339_p0), %s255_s29, 512  }
 0x155   : > { %465 = vsyncadd (!%p339_p0), %s255_s29, 4294966784  ;;  %p14_p2 = scmp.ge.s32.totalorder %s527_s12, 4   ;;  %s680_s6 = smov %s472_s7 }
 0x156   : > { %s681_s7 = smov %s476_s8  ;;  %s682_s8 = smov %s539_s15 }
 0x157   : > { %s683_s9 = smov %s527_s12  ;;  %16 = sbr.rel (!%p14_p2) target bundleno = 5 (0x5), region = 70 }
 0x15e   :  { %260 = vsyncpa [#allocation4], 1 }
 0x15f   :  { %262 = vsyncpa [#allocation4 + $0x1], 1 }
 0x160   :  { %263 = vsyncpa [#allocation5], 1 }
 0x161   :  { %265 = vsyncpa [#allocation5 + $0x1], 1 }

</bundles_post_ra>
